<compile_context>
chip_gen: v7x
topology: tpu7x:2x2x1
jax: 0.10.0
libtpu: 0.0.40
codegen_flags: <defaults>
</compile_context>

<pallas_src>
import math

import jax
import jax.numpy as jnp
from jax.experimental import pallas as pl
from jax.experimental.pallas import tpu as pltpu


def _make_kernel(tokens_per_block: int, scale: float):
    T = tokens_per_block

    def kernel(idx_ref, w_hbm, out_ref, sem):
        # idx_ref: SMEM (padded_tokens,) int32 (scalar prefetch)
        # w_hbm  : (V, D) embedding table, left in HBM (pl.ANY)
        # out_ref: (T, D) VMEM output block (row DMAs land here directly)
        # sem    : single DMA semaphore shared by all row copies
        base = pl.program_id(0) * T

        # Issue all T row-gather DMAs up front so they are all in flight together,
        # writing straight into the output block (no staging scratch).
        for t in range(T):
            token = idx_ref[base + t]
            pltpu.make_async_copy(
                w_hbm.at[pl.ds(token, 1)],   # (1, D) row in HBM
                out_ref.at[pl.ds(t, 1)],     # (1, D) row of the output block
                sem,
            ).start()

        # Every copy signals the same semaphore with an identical byte count, so T
        # equal-sized waits consume exactly the T completions (order-independent).
        for t in range(T):
            pltpu.make_async_copy(
                w_hbm.at[pl.ds(0, 1)],
                out_ref.at[pl.ds(t, 1)],
                sem,
            ).wait()

        if scale != 1.0:                     # trace-time constant; no-op path when 1.0
            out_ref[...] = out_ref[...] * scale

    return kernel


def token_embedding(x: jax.Array, weight: jax.Array, scale: float,
                    *, tokens_per_block: int = 64) -> jax.Array:
    """x: (B, S) int32 ids; weight: (V, D) float32; returns (B, S, D) float32."""
    B, S = x.shape
    V, D = weight.shape
    n_tokens = B * S

    # Token tile: multiple of 8 (full-sublane, unmasked output stores), capped so the
    # unrolled DMA issue/wait loops stay modest and the (T, D) double-buffered output
    # block fits comfortably in scoped VMEM even for large D.
    T = min(tokens_per_block, ((n_tokens + 7) // 8) * 8)
    T = max(8, (T // 8) * 8)
    padded = ((n_tokens + T - 1) // T) * T
    n_blocks = padded // T

    idx_flat = x.reshape(n_tokens).astype(jnp.int32)
    if padded != n_tokens:
        # Pad with id 0 (always a valid row); padded outputs are sliced off below.
        idx_flat = jnp.pad(idx_flat, (0, padded - n_tokens))

    grid_spec = pltpu.PrefetchScalarGridSpec(
        num_scalar_prefetch=1,                     # idx_flat -> SMEM
        grid=(n_blocks,),
        in_specs=[
            pl.BlockSpec(memory_space=pl.ANY),     # embedding table stays in HBM
        ],
        out_specs=pl.BlockSpec((T, D), lambda i, idx_ref: (i, 0)),
        scratch_shapes=[
            pltpu.SemaphoreType.DMA,               # one shared DMA semaphore
        ],
    )

    out_flat = pl.pallas_call(
        _make_kernel(T, float(scale)),
        out_shape=jax.ShapeDtypeStruct((padded, D), weight.dtype),
        grid_spec=grid_spec,
        compiler_params=pltpu.CompilerParams(
            # Each grid step is self-contained -> safe to shard the token axis
            # across both TensorCores on v7x.
            dimension_semantics=("parallel",),
        ),
    )(idx_flat, weight)

    return out_flat[:n_tokens].reshape(B, S, D)


def make_embedding_weight(key, num_embeddings: int, embedding_dim: int,
                          padding_idx, scale_embeddings: bool):
    """Mirrors TokenEmbedding.__init__ parameter setup (deterministic, synthetic)."""
    if scale_embeddings:
        std = embedding_dim ** (-0.5)
        w = jax.random.normal(key, (num_embeddings, embedding_dim), jnp.float32) * std
        scale = math.sqrt(embedding_dim)
    else:
        # nn.Embedding default init: N(0, 1)
        w = jax.random.normal(key, (num_embeddings, embedding_dim), jnp.float32)
        scale = 1.0
    if padding_idx is not None:
        w = w.at[padding_idx].set(0.0)
    return w, scale


if __name__ == "__main__":
    # Small, module-consistent shapes.
    num_embeddings = 64
    embedding_dim = 128
    padding_idx = 0
    scale_embeddings = True
    B, S = 2, 8

    key = jax.random.PRNGKey(0)
    k_w, k_x = jax.random.split(key)

    weight, scale = make_embedding_weight(
        k_w, num_embeddings, embedding_dim, padding_idx, scale_embeddings
    )
    x = jax.random.randint(k_x, (B, S), 0, num_embeddings, dtype=jnp.int32)

    out = jax.block_until_ready(token_embedding(x, weight, scale))

    # Reference check: plain-JAX gather * scale (same semantics as emb(x) * scale).
    ref = weight[x] * scale
    assert out.shape == (B, S, embedding_dim), out.shape
    assert jnp.allclose(out, ref, atol=1e-6, rtol=1e-6), "mismatch vs reference"

    # TODO(synk): padding_idx gradient masking (nn.Embedding backward semantics) and the
    # 8-bit StableEmbedding path are not represented; this kernel is forward-only fp32.
    print("KERNEL_OK")
</pallas_src>

<mosaic_0001>
module attributes {stable_mosaic.version = 11 : i64} {
  func.func @kernel(%arg0: i32, %arg1: memref<16xi32, #tpu.memory_space<smem>>, %arg2: memref<64x128xf32, #tpu.memory_space<any>>, %arg3: memref<16x128xf32, #tpu.memory_space<vmem>>, %arg4: memref<!tpu.dma_semaphore, #tpu.memory_space<semaphore_mem>>) attributes {dimension_semantics = [#tpu.dimension_semantics<parallel>], iteration_bounds = array<i64: 1>, scalar_prefetch = 1 : i64, scratch_operands = 1 : i64, tpu.core_type = #tpu.core_type<tc>, window_params = [{}, {transform_indices = @transform_1, window_bounds = array<i64: 16, 128>}]} {
    %c16_i32 = arith.constant 16 : i32
    %0 = arith.muli %arg0, %c16_i32 : i32
    %c0_i32 = arith.constant 0 : i32
    %1 = arith.addi %0, %c0_i32 : i32
    %2 = arith.index_cast %1 : i32 to index
    %3 = memref.load %arg1[%2] : memref<16xi32, #tpu.memory_space<smem>>
    %c0_i32_0 = arith.constant 0 : i32
    %4 = tpu.memref_slice %arg2[%3, %c0_i32_0] : memref<64x128xf32, #tpu.memory_space<any>> -> memref<1x128xf32, #tpu.memory_space<any>>
    %c0_i32_1 = arith.constant 0 : i32
    %c0_i32_2 = arith.constant 0 : i32
    %5 = tpu.memref_slice %arg3[%c0_i32_1, %c0_i32_2] : memref<16x128xf32, #tpu.memory_space<vmem>> -> memref<1x128xf32, #tpu.memory_space<vmem>>
    tpu.enqueue_dma source(%4 : memref<1x128xf32, #tpu.memory_space<any>>) target(%5 : memref<1x128xf32, #tpu.memory_space<vmem>>) target_semaphore(%arg4 : memref<!tpu.dma_semaphore, #tpu.memory_space<semaphore_mem>>)
    %c1_i32 = arith.constant 1 : i32
    %6 = arith.addi %0, %c1_i32 : i32
    %7 = arith.index_cast %6 : i32 to index
    %8 = memref.load %arg1[%7] : memref<16xi32, #tpu.memory_space<smem>>
    %c0_i32_3 = arith.constant 0 : i32
    %9 = tpu.memref_slice %arg2[%8, %c0_i32_3] : memref<64x128xf32, #tpu.memory_space<any>> -> memref<1x128xf32, #tpu.memory_space<any>>
    %c1_i32_4 = arith.constant 1 : i32
    %c0_i32_5 = arith.constant 0 : i32
    %10 = tpu.memref_slice %arg3[%c1_i32_4, %c0_i32_5] : memref<16x128xf32, #tpu.memory_space<vmem>> -> memref<1x128xf32, #tpu.memory_space<vmem>>
    tpu.enqueue_dma source(%9 : memref<1x128xf32, #tpu.memory_space<any>>) target(%10 : memref<1x128xf32, #tpu.memory_space<vmem>>) target_semaphore(%arg4 : memref<!tpu.dma_semaphore, #tpu.memory_space<semaphore_mem>>)
    %c2_i32 = arith.constant 2 : i32
    %11 = arith.addi %0, %c2_i32 : i32
    %12 = arith.index_cast %11 : i32 to index
    %13 = memref.load %arg1[%12] : memref<16xi32, #tpu.memory_space<smem>>
    %c0_i32_6 = arith.constant 0 : i32
    %14 = tpu.memref_slice %arg2[%13, %c0_i32_6] : memref<64x128xf32, #tpu.memory_space<any>> -> memref<1x128xf32, #tpu.memory_space<any>>
    %c2_i32_7 = arith.constant 2 : i32
    %c0_i32_8 = arith.constant 0 : i32
    %15 = tpu.memref_slice %arg3[%c2_i32_7, %c0_i32_8] : memref<16x128xf32, #tpu.memory_space<vmem>> -> memref<1x128xf32, #tpu.memory_space<vmem>>
    tpu.enqueue_dma source(%14 : memref<1x128xf32, #tpu.memory_space<any>>) target(%15 : memref<1x128xf32, #tpu.memory_space<vmem>>) target_semaphore(%arg4 : memref<!tpu.dma_semaphore, #tpu.memory_space<semaphore_mem>>)
    %c3_i32 = arith.constant 3 : i32
    %16 = arith.addi %0, %c3_i32 : i32
    %17 = arith.index_cast %16 : i32 to index
    %18 = memref.load %arg1[%17] : memref<16xi32, #tpu.memory_space<smem>>
    %c0_i32_9 = arith.constant 0 : i32
    %19 = tpu.memref_slice %arg2[%18, %c0_i32_9] : memref<64x128xf32, #tpu.memory_space<any>> -> memref<1x128xf32, #tpu.memory_space<any>>
    %c3_i32_10 = arith.constant 3 : i32
    %c0_i32_11 = arith.constant 0 : i32
    %20 = tpu.memref_slice %arg3[%c3_i32_10, %c0_i32_11] : memref<16x128xf32, #tpu.memory_space<vmem>> -> memref<1x128xf32, #tpu.memory_space<vmem>>
    tpu.enqueue_dma source(%19 : memref<1x128xf32, #tpu.memory_space<any>>) target(%20 : memref<1x128xf32, #tpu.memory_space<vmem>>) target_semaphore(%arg4 : memref<!tpu.dma_semaphore, #tpu.memory_space<semaphore_mem>>)
    %c4_i32 = arith.constant 4 : i32
    %21 = arith.addi %0, %c4_i32 : i32
    %22 = arith.index_cast %21 : i32 to index
    %23 = memref.load %arg1[%22] : memref<16xi32, #tpu.memory_space<smem>>
    %c0_i32_12 = arith.constant 0 : i32
    %24 = tpu.memref_slice %arg2[%23, %c0_i32_12] : memref<64x128xf32, #tpu.memory_space<any>> -> memref<1x128xf32, #tpu.memory_space<any>>
    %c4_i32_13 = arith.constant 4 : i32
    %c0_i32_14 = arith.constant 0 : i32
    %25 = tpu.memref_slice %arg3[%c4_i32_13, %c0_i32_14] : memref<16x128xf32, #tpu.memory_space<vmem>> -> memref<1x128xf32, #tpu.memory_space<vmem>>
    tpu.enqueue_dma source(%24 : memref<1x128xf32, #tpu.memory_space<any>>) target(%25 : memref<1x128xf32, #tpu.memory_space<vmem>>) target_semaphore(%arg4 : memref<!tpu.dma_semaphore, #tpu.memory_space<semaphore_mem>>)
    %c5_i32 = arith.constant 5 : i32
    %26 = arith.addi %0, %c5_i32 : i32
    %27 = arith.index_cast %26 : i32 to index
    %28 = memref.load %arg1[%27] : memref<16xi32, #tpu.memory_space<smem>>
    %c0_i32_15 = arith.constant 0 : i32
    %29 = tpu.memref_slice %arg2[%28, %c0_i32_15] : memref<64x128xf32, #tpu.memory_space<any>> -> memref<1x128xf32, #tpu.memory_space<any>>
    %c5_i32_16 = arith.constant 5 : i32
    %c0_i32_17 = arith.constant 0 : i32
    %30 = tpu.memref_slice %arg3[%c5_i32_16, %c0_i32_17] : memref<16x128xf32, #tpu.memory_space<vmem>> -> memref<1x128xf32, #tpu.memory_space<vmem>>
    tpu.enqueue_dma source(%29 : memref<1x128xf32, #tpu.memory_space<any>>) target(%30 : memref<1x128xf32, #tpu.memory_space<vmem>>) target_semaphore(%arg4 : memref<!tpu.dma_semaphore, #tpu.memory_space<semaphore_mem>>)
    %c6_i32 = arith.constant 6 : i32
    %31 = arith.addi %0, %c6_i32 : i32
    %32 = arith.index_cast %31 : i32 to index
    %33 = memref.load %arg1[%32] : memref<16xi32, #tpu.memory_space<smem>>
    %c0_i32_18 = arith.constant 0 : i32
    %34 = tpu.memref_slice %arg2[%33, %c0_i32_18] : memref<64x128xf32, #tpu.memory_space<any>> -> memref<1x128xf32, #tpu.memory_space<any>>
    %c6_i32_19 = arith.constant 6 : i32
    %c0_i32_20 = arith.constant 0 : i32
    %35 = tpu.memref_slice %arg3[%c6_i32_19, %c0_i32_20] : memref<16x128xf32, #tpu.memory_space<vmem>> -> memref<1x128xf32, #tpu.memory_space<vmem>>
    tpu.enqueue_dma source(%34 : memref<1x128xf32, #tpu.memory_space<any>>) target(%35 : memref<1x128xf32, #tpu.memory_space<vmem>>) target_semaphore(%arg4 : memref<!tpu.dma_semaphore, #tpu.memory_space<semaphore_mem>>)
    %c7_i32 = arith.constant 7 : i32
    %36 = arith.addi %0, %c7_i32 : i32
    %37 = arith.index_cast %36 : i32 to index
    %38 = memref.load %arg1[%37] : memref<16xi32, #tpu.memory_space<smem>>
    %c0_i32_21 = arith.constant 0 : i32
    %39 = tpu.memref_slice %arg2[%38, %c0_i32_21] : memref<64x128xf32, #tpu.memory_space<any>> -> memref<1x128xf32, #tpu.memory_space<any>>
    %c7_i32_22 = arith.constant 7 : i32
    %c0_i32_23 = arith.constant 0 : i32
    %40 = tpu.memref_slice %arg3[%c7_i32_22, %c0_i32_23] : memref<16x128xf32, #tpu.memory_space<vmem>> -> memref<1x128xf32, #tpu.memory_space<vmem>>
    tpu.enqueue_dma source(%39 : memref<1x128xf32, #tpu.memory_space<any>>) target(%40 : memref<1x128xf32, #tpu.memory_space<vmem>>) target_semaphore(%arg4 : memref<!tpu.dma_semaphore, #tpu.memory_space<semaphore_mem>>)
    %c8_i32 = arith.constant 8 : i32
    %41 = arith.addi %0, %c8_i32 : i32
    %42 = arith.index_cast %41 : i32 to index
    %43 = memref.load %arg1[%42] : memref<16xi32, #tpu.memory_space<smem>>
    %c0_i32_24 = arith.constant 0 : i32
    %44 = tpu.memref_slice %arg2[%43, %c0_i32_24] : memref<64x128xf32, #tpu.memory_space<any>> -> memref<1x128xf32, #tpu.memory_space<any>>
    %c8_i32_25 = arith.constant 8 : i32
    %c0_i32_26 = arith.constant 0 : i32
    %45 = tpu.memref_slice %arg3[%c8_i32_25, %c0_i32_26] : memref<16x128xf32, #tpu.memory_space<vmem>> -> memref<1x128xf32, #tpu.memory_space<vmem>>
    tpu.enqueue_dma source(%44 : memref<1x128xf32, #tpu.memory_space<any>>) target(%45 : memref<1x128xf32, #tpu.memory_space<vmem>>) target_semaphore(%arg4 : memref<!tpu.dma_semaphore, #tpu.memory_space<semaphore_mem>>)
    %c9_i32 = arith.constant 9 : i32
    %46 = arith.addi %0, %c9_i32 : i32
    %47 = arith.index_cast %46 : i32 to index
    %48 = memref.load %arg1[%47] : memref<16xi32, #tpu.memory_space<smem>>
    %c0_i32_27 = arith.constant 0 : i32
    %49 = tpu.memref_slice %arg2[%48, %c0_i32_27] : memref<64x128xf32, #tpu.memory_space<any>> -> memref<1x128xf32, #tpu.memory_space<any>>
    %c9_i32_28 = arith.constant 9 : i32
    %c0_i32_29 = arith.constant 0 : i32
    %50 = tpu.memref_slice %arg3[%c9_i32_28, %c0_i32_29] : memref<16x128xf32, #tpu.memory_space<vmem>> -> memref<1x128xf32, #tpu.memory_space<vmem>>
    tpu.enqueue_dma source(%49 : memref<1x128xf32, #tpu.memory_space<any>>) target(%50 : memref<1x128xf32, #tpu.memory_space<vmem>>) target_semaphore(%arg4 : memref<!tpu.dma_semaphore, #tpu.memory_space<semaphore_mem>>)
    %c10_i32 = arith.constant 10 : i32
    %51 = arith.addi %0, %c10_i32 : i32
    %52 = arith.index_cast %51 : i32 to index
    %53 = memref.load %arg1[%52] : memref<16xi32, #tpu.memory_space<smem>>
    %c0_i32_30 = arith.constant 0 : i32
    %54 = tpu.memref_slice %arg2[%53, %c0_i32_30] : memref<64x128xf32, #tpu.memory_space<any>> -> memref<1x128xf32, #tpu.memory_space<any>>
    %c10_i32_31 = arith.constant 10 : i32
    %c0_i32_32 = arith.constant 0 : i32
    %55 = tpu.memref_slice %arg3[%c10_i32_31, %c0_i32_32] : memref<16x128xf32, #tpu.memory_space<vmem>> -> memref<1x128xf32, #tpu.memory_space<vmem>>
    tpu.enqueue_dma source(%54 : memref<1x128xf32, #tpu.memory_space<any>>) target(%55 : memref<1x128xf32, #tpu.memory_space<vmem>>) target_semaphore(%arg4 : memref<!tpu.dma_semaphore, #tpu.memory_space<semaphore_mem>>)
    %c11_i32 = arith.constant 11 : i32
    %56 = arith.addi %0, %c11_i32 : i32
    %57 = arith.index_cast %56 : i32 to index
    %58 = memref.load %arg1[%57] : memref<16xi32, #tpu.memory_space<smem>>
    %c0_i32_33 = arith.constant 0 : i32
    %59 = tpu.memref_slice %arg2[%58, %c0_i32_33] : memref<64x128xf32, #tpu.memory_space<any>> -> memref<1x128xf32, #tpu.memory_space<any>>
    %c11_i32_34 = arith.constant 11 : i32
    %c0_i32_35 = arith.constant 0 : i32
    %60 = tpu.memref_slice %arg3[%c11_i32_34, %c0_i32_35] : memref<16x128xf32, #tpu.memory_space<vmem>> -> memref<1x128xf32, #tpu.memory_space<vmem>>
    tpu.enqueue_dma source(%59 : memref<1x128xf32, #tpu.memory_space<any>>) target(%60 : memref<1x128xf32, #tpu.memory_space<vmem>>) target_semaphore(%arg4 : memref<!tpu.dma_semaphore, #tpu.memory_space<semaphore_mem>>)
    %c12_i32 = arith.constant 12 : i32
    %61 = arith.addi %0, %c12_i32 : i32
    %62 = arith.index_cast %61 : i32 to index
    %63 = memref.load %arg1[%62] : memref<16xi32, #tpu.memory_space<smem>>
    %c0_i32_36 = arith.constant 0 : i32
    %64 = tpu.memref_slice %arg2[%63, %c0_i32_36] : memref<64x128xf32, #tpu.memory_space<any>> -> memref<1x128xf32, #tpu.memory_space<any>>
    %c12_i32_37 = arith.constant 12 : i32
    %c0_i32_38 = arith.constant 0 : i32
    %65 = tpu.memref_slice %arg3[%c12_i32_37, %c0_i32_38] : memref<16x128xf32, #tpu.memory_space<vmem>> -> memref<1x128xf32, #tpu.memory_space<vmem>>
    tpu.enqueue_dma source(%64 : memref<1x128xf32, #tpu.memory_space<any>>) target(%65 : memref<1x128xf32, #tpu.memory_space<vmem>>) target_semaphore(%arg4 : memref<!tpu.dma_semaphore, #tpu.memory_space<semaphore_mem>>)
    %c13_i32 = arith.constant 13 : i32
    %66 = arith.addi %0, %c13_i32 : i32
    %67 = arith.index_cast %66 : i32 to index
    %68 = memref.load %arg1[%67] : memref<16xi32, #tpu.memory_space<smem>>
    %c0_i32_39 = arith.constant 0 : i32
    %69 = tpu.memref_slice %arg2[%68, %c0_i32_39] : memref<64x128xf32, #tpu.memory_space<any>> -> memref<1x128xf32, #tpu.memory_space<any>>
    %c13_i32_40 = arith.constant 13 : i32
    %c0_i32_41 = arith.constant 0 : i32
    %70 = tpu.memref_slice %arg3[%c13_i32_40, %c0_i32_41] : memref<16x128xf32, #tpu.memory_space<vmem>> -> memref<1x128xf32, #tpu.memory_space<vmem>>
    tpu.enqueue_dma source(%69 : memref<1x128xf32, #tpu.memory_space<any>>) target(%70 : memref<1x128xf32, #tpu.memory_space<vmem>>) target_semaphore(%arg4 : memref<!tpu.dma_semaphore, #tpu.memory_space<semaphore_mem>>)
    %c14_i32 = arith.constant 14 : i32
    %71 = arith.addi %0, %c14_i32 : i32
    %72 = arith.index_cast %71 : i32 to index
    %73 = memref.load %arg1[%72] : memref<16xi32, #tpu.memory_space<smem>>
    %c0_i32_42 = arith.constant 0 : i32
    %74 = tpu.memref_slice %arg2[%73, %c0_i32_42] : memref<64x128xf32, #tpu.memory_space<any>> -> memref<1x128xf32, #tpu.memory_space<any>>
    %c14_i32_43 = arith.constant 14 : i32
    %c0_i32_44 = arith.constant 0 : i32
    %75 = tpu.memref_slice %arg3[%c14_i32_43, %c0_i32_44] : memref<16x128xf32, #tpu.memory_space<vmem>> -> memref<1x128xf32, #tpu.memory_space<vmem>>
    tpu.enqueue_dma source(%74 : memref<1x128xf32, #tpu.memory_space<any>>) target(%75 : memref<1x128xf32, #tpu.memory_space<vmem>>) target_semaphore(%arg4 : memref<!tpu.dma_semaphore, #tpu.memory_space<semaphore_mem>>)
    %c15_i32 = arith.constant 15 : i32
    %76 = arith.addi %0, %c15_i32 : i32
    %77 = arith.index_cast %76 : i32 to index
    %78 = memref.load %arg1[%77] : memref<16xi32, #tpu.memory_space<smem>>
    %c0_i32_45 = arith.constant 0 : i32
    %79 = tpu.memref_slice %arg2[%78, %c0_i32_45] : memref<64x128xf32, #tpu.memory_space<any>> -> memref<1x128xf32, #tpu.memory_space<any>>
    %c15_i32_46 = arith.constant 15 : i32
    %c0_i32_47 = arith.constant 0 : i32
    %80 = tpu.memref_slice %arg3[%c15_i32_46, %c0_i32_47] : memref<16x128xf32, #tpu.memory_space<vmem>> -> memref<1x128xf32, #tpu.memory_space<vmem>>
    tpu.enqueue_dma source(%79 : memref<1x128xf32, #tpu.memory_space<any>>) target(%80 : memref<1x128xf32, #tpu.memory_space<vmem>>) target_semaphore(%arg4 : memref<!tpu.dma_semaphore, #tpu.memory_space<semaphore_mem>>)
    %c0_i32_48 = arith.constant 0 : i32
    %c0_i32_49 = arith.constant 0 : i32
    %81 = tpu.memref_slice %arg2[%c0_i32_48, %c0_i32_49] : memref<64x128xf32, #tpu.memory_space<any>> -> memref<1x128xf32, #tpu.memory_space<any>>
    %c0_i32_50 = arith.constant 0 : i32
    %c0_i32_51 = arith.constant 0 : i32
    %82 = tpu.memref_slice %arg3[%c0_i32_50, %c0_i32_51] : memref<16x128xf32, #tpu.memory_space<vmem>> -> memref<1x128xf32, #tpu.memory_space<vmem>>
    tpu.wait_dma2 semaphore(%arg4 : memref<!tpu.dma_semaphore, #tpu.memory_space<semaphore_mem>>) src(%81 : memref<1x128xf32, #tpu.memory_space<any>>) dst(%82 : memref<1x128xf32, #tpu.memory_space<vmem>>)
    %c0_i32_52 = arith.constant 0 : i32
    %c0_i32_53 = arith.constant 0 : i32
    %83 = tpu.memref_slice %arg2[%c0_i32_52, %c0_i32_53] : memref<64x128xf32, #tpu.memory_space<any>> -> memref<1x128xf32, #tpu.memory_space<any>>
    %c1_i32_54 = arith.constant 1 : i32
    %c0_i32_55 = arith.constant 0 : i32
    %84 = tpu.memref_slice %arg3[%c1_i32_54, %c0_i32_55] : memref<16x128xf32, #tpu.memory_space<vmem>> -> memref<1x128xf32, #tpu.memory_space<vmem>>
    tpu.wait_dma2 semaphore(%arg4 : memref<!tpu.dma_semaphore, #tpu.memory_space<semaphore_mem>>) src(%83 : memref<1x128xf32, #tpu.memory_space<any>>) dst(%84 : memref<1x128xf32, #tpu.memory_space<vmem>>)
    %c0_i32_56 = arith.constant 0 : i32
    %c0_i32_57 = arith.constant 0 : i32
    %85 = tpu.memref_slice %arg2[%c0_i32_56, %c0_i32_57] : memref<64x128xf32, #tpu.memory_space<any>> -> memref<1x128xf32, #tpu.memory_space<any>>
    %c2_i32_58 = arith.constant 2 : i32
    %c0_i32_59 = arith.constant 0 : i32
    %86 = tpu.memref_slice %arg3[%c2_i32_58, %c0_i32_59] : memref<16x128xf32, #tpu.memory_space<vmem>> -> memref<1x128xf32, #tpu.memory_space<vmem>>
    tpu.wait_dma2 semaphore(%arg4 : memref<!tpu.dma_semaphore, #tpu.memory_space<semaphore_mem>>) src(%85 : memref<1x128xf32, #tpu.memory_space<any>>) dst(%86 : memref<1x128xf32, #tpu.memory_space<vmem>>)
    %c0_i32_60 = arith.constant 0 : i32
    %c0_i32_61 = arith.constant 0 : i32
    %87 = tpu.memref_slice %arg2[%c0_i32_60, %c0_i32_61] : memref<64x128xf32, #tpu.memory_space<any>> -> memref<1x128xf32, #tpu.memory_space<any>>
    %c3_i32_62 = arith.constant 3 : i32
    %c0_i32_63 = arith.constant 0 : i32
    %88 = tpu.memref_slice %arg3[%c3_i32_62, %c0_i32_63] : memref<16x128xf32, #tpu.memory_space<vmem>> -> memref<1x128xf32, #tpu.memory_space<vmem>>
    tpu.wait_dma2 semaphore(%arg4 : memref<!tpu.dma_semaphore, #tpu.memory_space<semaphore_mem>>) src(%87 : memref<1x128xf32, #tpu.memory_space<any>>) dst(%88 : memref<1x128xf32, #tpu.memory_space<vmem>>)
    %c0_i32_64 = arith.constant 0 : i32
    %c0_i32_65 = arith.constant 0 : i32
    %89 = tpu.memref_slice %arg2[%c0_i32_64, %c0_i32_65] : memref<64x128xf32, #tpu.memory_space<any>> -> memref<1x128xf32, #tpu.memory_space<any>>
    %c4_i32_66 = arith.constant 4 : i32
    %c0_i32_67 = arith.constant 0 : i32
    %90 = tpu.memref_slice %arg3[%c4_i32_66, %c0_i32_67] : memref<16x128xf32, #tpu.memory_space<vmem>> -> memref<1x128xf32, #tpu.memory_space<vmem>>
    tpu.wait_dma2 semaphore(%arg4 : memref<!tpu.dma_semaphore, #tpu.memory_space<semaphore_mem>>) src(%89 : memref<1x128xf32, #tpu.memory_space<any>>) dst(%90 : memref<1x128xf32, #tpu.memory_space<vmem>>)
    %c0_i32_68 = arith.constant 0 : i32
    %c0_i32_69 = arith.constant 0 : i32
    %91 = tpu.memref_slice %arg2[%c0_i32_68, %c0_i32_69] : memref<64x128xf32, #tpu.memory_space<any>> -> memref<1x128xf32, #tpu.memory_space<any>>
    %c5_i32_70 = arith.constant 5 : i32
    %c0_i32_71 = arith.constant 0 : i32
    %92 = tpu.memref_slice %arg3[%c5_i32_70, %c0_i32_71] : memref<16x128xf32, #tpu.memory_space<vmem>> -> memref<1x128xf32, #tpu.memory_space<vmem>>
    tpu.wait_dma2 semaphore(%arg4 : memref<!tpu.dma_semaphore, #tpu.memory_space<semaphore_mem>>) src(%91 : memref<1x128xf32, #tpu.memory_space<any>>) dst(%92 : memref<1x128xf32, #tpu.memory_space<vmem>>)
    %c0_i32_72 = arith.constant 0 : i32
    %c0_i32_73 = arith.constant 0 : i32
    %93 = tpu.memref_slice %arg2[%c0_i32_72, %c0_i32_73] : memref<64x128xf32, #tpu.memory_space<any>> -> memref<1x128xf32, #tpu.memory_space<any>>
    %c6_i32_74 = arith.constant 6 : i32
    %c0_i32_75 = arith.constant 0 : i32
    %94 = tpu.memref_slice %arg3[%c6_i32_74, %c0_i32_75] : memref<16x128xf32, #tpu.memory_space<vmem>> -> memref<1x128xf32, #tpu.memory_space<vmem>>
    tpu.wait_dma2 semaphore(%arg4 : memref<!tpu.dma_semaphore, #tpu.memory_space<semaphore_mem>>) src(%93 : memref<1x128xf32, #tpu.memory_space<any>>) dst(%94 : memref<1x128xf32, #tpu.memory_space<vmem>>)
    %c0_i32_76 = arith.constant 0 : i32
    %c0_i32_77 = arith.constant 0 : i32
    %95 = tpu.memref_slice %arg2[%c0_i32_76, %c0_i32_77] : memref<64x128xf32, #tpu.memory_space<any>> -> memref<1x128xf32, #tpu.memory_space<any>>
    %c7_i32_78 = arith.constant 7 : i32
    %c0_i32_79 = arith.constant 0 : i32
    %96 = tpu.memref_slice %arg3[%c7_i32_78, %c0_i32_79] : memref<16x128xf32, #tpu.memory_space<vmem>> -> memref<1x128xf32, #tpu.memory_space<vmem>>
    tpu.wait_dma2 semaphore(%arg4 : memref<!tpu.dma_semaphore, #tpu.memory_space<semaphore_mem>>) src(%95 : memref<1x128xf32, #tpu.memory_space<any>>) dst(%96 : memref<1x128xf32, #tpu.memory_space<vmem>>)
    %c0_i32_80 = arith.constant 0 : i32
    %c0_i32_81 = arith.constant 0 : i32
    %97 = tpu.memref_slice %arg2[%c0_i32_80, %c0_i32_81] : memref<64x128xf32, #tpu.memory_space<any>> -> memref<1x128xf32, #tpu.memory_space<any>>
    %c8_i32_82 = arith.constant 8 : i32
    %c0_i32_83 = arith.constant 0 : i32
    %98 = tpu.memref_slice %arg3[%c8_i32_82, %c0_i32_83] : memref<16x128xf32, #tpu.memory_space<vmem>> -> memref<1x128xf32, #tpu.memory_space<vmem>>
    tpu.wait_dma2 semaphore(%arg4 : memref<!tpu.dma_semaphore, #tpu.memory_space<semaphore_mem>>) src(%97 : memref<1x128xf32, #tpu.memory_space<any>>) dst(%98 : memref<1x128xf32, #tpu.memory_space<vmem>>)
    %c0_i32_84 = arith.constant 0 : i32
    %c0_i32_85 = arith.constant 0 : i32
    %99 = tpu.memref_slice %arg2[%c0_i32_84, %c0_i32_85] : memref<64x128xf32, #tpu.memory_space<any>> -> memref<1x128xf32, #tpu.memory_space<any>>
    %c9_i32_86 = arith.constant 9 : i32
    %c0_i32_87 = arith.constant 0 : i32
    %100 = tpu.memref_slice %arg3[%c9_i32_86, %c0_i32_87] : memref<16x128xf32, #tpu.memory_space<vmem>> -> memref<1x128xf32, #tpu.memory_space<vmem>>
    tpu.wait_dma2 semaphore(%arg4 : memref<!tpu.dma_semaphore, #tpu.memory_space<semaphore_mem>>) src(%99 : memref<1x128xf32, #tpu.memory_space<any>>) dst(%100 : memref<1x128xf32, #tpu.memory_space<vmem>>)
    %c0_i32_88 = arith.constant 0 : i32
    %c0_i32_89 = arith.constant 0 : i32
    %101 = tpu.memref_slice %arg2[%c0_i32_88, %c0_i32_89] : memref<64x128xf32, #tpu.memory_space<any>> -> memref<1x128xf32, #tpu.memory_space<any>>
    %c10_i32_90 = arith.constant 10 : i32
    %c0_i32_91 = arith.constant 0 : i32
    %102 = tpu.memref_slice %arg3[%c10_i32_90, %c0_i32_91] : memref<16x128xf32, #tpu.memory_space<vmem>> -> memref<1x128xf32, #tpu.memory_space<vmem>>
    tpu.wait_dma2 semaphore(%arg4 : memref<!tpu.dma_semaphore, #tpu.memory_space<semaphore_mem>>) src(%101 : memref<1x128xf32, #tpu.memory_space<any>>) dst(%102 : memref<1x128xf32, #tpu.memory_space<vmem>>)
    %c0_i32_92 = arith.constant 0 : i32
    %c0_i32_93 = arith.constant 0 : i32
    %103 = tpu.memref_slice %arg2[%c0_i32_92, %c0_i32_93] : memref<64x128xf32, #tpu.memory_space<any>> -> memref<1x128xf32, #tpu.memory_space<any>>
    %c11_i32_94 = arith.constant 11 : i32
    %c0_i32_95 = arith.constant 0 : i32
    %104 = tpu.memref_slice %arg3[%c11_i32_94, %c0_i32_95] : memref<16x128xf32, #tpu.memory_space<vmem>> -> memref<1x128xf32, #tpu.memory_space<vmem>>
    tpu.wait_dma2 semaphore(%arg4 : memref<!tpu.dma_semaphore, #tpu.memory_space<semaphore_mem>>) src(%103 : memref<1x128xf32, #tpu.memory_space<any>>) dst(%104 : memref<1x128xf32, #tpu.memory_space<vmem>>)
    %c0_i32_96 = arith.constant 0 : i32
    %c0_i32_97 = arith.constant 0 : i32
    %105 = tpu.memref_slice %arg2[%c0_i32_96, %c0_i32_97] : memref<64x128xf32, #tpu.memory_space<any>> -> memref<1x128xf32, #tpu.memory_space<any>>
    %c12_i32_98 = arith.constant 12 : i32
    %c0_i32_99 = arith.constant 0 : i32
    %106 = tpu.memref_slice %arg3[%c12_i32_98, %c0_i32_99] : memref<16x128xf32, #tpu.memory_space<vmem>> -> memref<1x128xf32, #tpu.memory_space<vmem>>
    tpu.wait_dma2 semaphore(%arg4 : memref<!tpu.dma_semaphore, #tpu.memory_space<semaphore_mem>>) src(%105 : memref<1x128xf32, #tpu.memory_space<any>>) dst(%106 : memref<1x128xf32, #tpu.memory_space<vmem>>)
    %c0_i32_100 = arith.constant 0 : i32
    %c0_i32_101 = arith.constant 0 : i32
    %107 = tpu.memref_slice %arg2[%c0_i32_100, %c0_i32_101] : memref<64x128xf32, #tpu.memory_space<any>> -> memref<1x128xf32, #tpu.memory_space<any>>
    %c13_i32_102 = arith.constant 13 : i32
    %c0_i32_103 = arith.constant 0 : i32
    %108 = tpu.memref_slice %arg3[%c13_i32_102, %c0_i32_103] : memref<16x128xf32, #tpu.memory_space<vmem>> -> memref<1x128xf32, #tpu.memory_space<vmem>>
    tpu.wait_dma2 semaphore(%arg4 : memref<!tpu.dma_semaphore, #tpu.memory_space<semaphore_mem>>) src(%107 : memref<1x128xf32, #tpu.memory_space<any>>) dst(%108 : memref<1x128xf32, #tpu.memory_space<vmem>>)
    %c0_i32_104 = arith.constant 0 : i32
    %c0_i32_105 = arith.constant 0 : i32
    %109 = tpu.memref_slice %arg2[%c0_i32_104, %c0_i32_105] : memref<64x128xf32, #tpu.memory_space<any>> -> memref<1x128xf32, #tpu.memory_space<any>>
    %c14_i32_106 = arith.constant 14 : i32
    %c0_i32_107 = arith.constant 0 : i32
    %110 = tpu.memref_slice %arg3[%c14_i32_106, %c0_i32_107] : memref<16x128xf32, #tpu.memory_space<vmem>> -> memref<1x128xf32, #tpu.memory_space<vmem>>
    tpu.wait_dma2 semaphore(%arg4 : memref<!tpu.dma_semaphore, #tpu.memory_space<semaphore_mem>>) src(%109 : memref<1x128xf32, #tpu.memory_space<any>>) dst(%110 : memref<1x128xf32, #tpu.memory_space<vmem>>)
    %c0_i32_108 = arith.constant 0 : i32
    %c0_i32_109 = arith.constant 0 : i32
    %111 = tpu.memref_slice %arg2[%c0_i32_108, %c0_i32_109] : memref<64x128xf32, #tpu.memory_space<any>> -> memref<1x128xf32, #tpu.memory_space<any>>
    %c15_i32_110 = arith.constant 15 : i32
    %c0_i32_111 = arith.constant 0 : i32
    %112 = tpu.memref_slice %arg3[%c15_i32_110, %c0_i32_111] : memref<16x128xf32, #tpu.memory_space<vmem>> -> memref<1x128xf32, #tpu.memory_space<vmem>>
    tpu.wait_dma2 semaphore(%arg4 : memref<!tpu.dma_semaphore, #tpu.memory_space<semaphore_mem>>) src(%111 : memref<1x128xf32, #tpu.memory_space<any>>) dst(%112 : memref<1x128xf32, #tpu.memory_space<vmem>>)
    %c0 = arith.constant 0 : index
    %c0_112 = arith.constant 0 : index
    %113 = vector.load %arg3[%c0, %c0_112] : memref<16x128xf32, #tpu.memory_space<vmem>>, vector<16x128xf32>
    %cst = arith.constant 11.3137083 : f32
    %114 = vector.broadcast %cst : f32 to vector<16x128xf32>
    %115 = arith.mulf %113, %114 : vector<16x128xf32>
    %c0_113 = arith.constant 0 : index
    %c0_114 = arith.constant 0 : index
    %116 = vector.load %arg3[%c0_113, %c0_114] : memref<16x128xf32, #tpu.memory_space<vmem>>, vector<16x128xf32>
    tpu.vector_store %arg3[%c0_113, %c0_114], %115 {strides = array<i32>} : memref<16x128xf32, #tpu.memory_space<vmem>>, vector<16x128xf32>,
    return
  }
  func.func @transform_1(%arg0: i32, %arg1: memref<16xi32, #tpu.memory_space<smem>>) -> (i32, i32) {
    %c0_i32 = arith.constant 0 : i32
    %c0_i32_0 = arith.constant 0 : i32
    return %arg0, %c0_i32 : i32, i32
  }
}

</mosaic_0001>

<bundles_post_ra>
// kernel: tpu_custom_call.1
= control target key start
LH: loop header
LB: loop body
LE: loop exit
PB: predicated region body
PF: predicated region fallthrough
CT: control target
= control target key end

     0   :  { %s1165_s0 = inlined_call_operand.hbm [shape: s32[16], index: 0, kind: input, shape index: {}]   ;;  %s1166_s1 = inlined_call_operand.hbm [shape: f32[64,128], index: 1, kind: input, shape index: {}]   ;;  %s1167_s2 = inlined_call_operand.hbm [shape: f32[16,128], index: 2, kind: output, shape index: {}]  }
   0x1   :  { %s411_s11 = scalar_lea.hbm %s1165_s0, 16 }
   0x2   :  { %p412_p0 = scmp.ne.s32.totalorder %s1165_s0, %s411_s11  ;;  %p415_p1 = scmp.lt.u32.totalorder %s411_s11, %s1165_s0 }
   0x4   :  { %p417_p2 = pnand %p415_p1, %p412_p0 }
   0x6   :  { %420 = shalt.err (!%p417_p2)  }
   0x7   :  { %s833_s16 = smov [#allocation4]  }
   0x8   :  { %8 = dma.hbm_to_smem %s1165_s0, 16, %s833_s16, [#allocation3] }
   0x9   :  { %827 = dma.done.wait [#allocation3], 16 }
   0xa   :  { %828 = vsyncadd [#allocation3], 4294967280 }
   0xb   :  { %10 = sfence }
   0xc   :  { %11 = vsyncpa [#allocation6], 0  ;;  %s13_s19 = sld [smem:[#allocation4]]  ;;  %s834_s20 = smov [#allocation5]  }
   0xd   :  { %s23_s21 = sshll.u32 %s834_s20, 4  ;;  %s879_s22 = sld [smem:[#allocation4 + $0x1]]  ;;  %s881_s21 = int_to_ptr.vmem [resolvable:$true] %s23_s21 }
   0xe   :  { %s835_s23 = smov [#allocation5 + $0x1]   ;;  %s883_s25 = sld [smem:[#allocation4 + $0x2]] }
   0xf   :  { %s39_s24 = sshll.u32 %s835_s23, 4  ;;  %s836_s26 = smov [#allocation5 + $0x2]   ;;  %s885_s24 = int_to_ptr.vmem [resolvable:$true] %s39_s24 }
  0x10   :  { %s55_s0 = sshll.u32 %s836_s26, 4  ;;  %s887_s27 = sld [smem:[#allocation4 + $0x3]]  ;;  %s889_s0 = int_to_ptr.vmem [resolvable:$true] %s55_s0 }
  0x11   :  { %s898_s8 = scalar_lea.hbm %s1166_s1, 1024 }
  0x12   :  { %s360_s28 = sshll.u32 %s13_s19, 4 }
  0x13   :  { %s15_s3 = scalar_lea.hbm %s1166_s1, %s360_s28  ;;  %s362_s4 = sshll.u32 %s879_s22, 4 }
  0x14   :  { %s421_s5 = scalar_lea.hbm %s15_s3, 16  ;;  %p424_p4 = scmp.lt.u32.totalorder %s15_s3, %s1166_s1 }
  0x15   :  { %p422_p3 = scmp.ne.s32.totalorder %s15_s3, %s421_s5  ;;  %p425_p5 = scmp.lt.u32.totalorder %s898_s8, %s421_s5 }
  0x16   :  { %p427_p7 = scmp.lt.u32.totalorder %s421_s5, %s15_s3 }
  0x17   :  { %p426_p6 = por %p425_p5, %p424_p4 }
  0x19   :  { %p428_p8 = por %p427_p7, %p426_p6 }
  0x1b   :  { %p429_p9 = pnand %p428_p8, %p422_p3 }
  0x1d   :  { %432 = shalt.err (!%p429_p9)  }
  0x1e   :  { %s433_s11 = scalar_lea.vmem %s881_s21, 16  ;;  %s907_s12 = scalar_lea.vmem %s881_s21, 256 }
  0x1f   :  { %p434_p10 = scmp.ne.s32.totalorder %s881_s21, %s433_s11  ;;  %p438_p11 = scmp.lt.s32.totalorder %s881_s21, %s881_s21 }
  0x20   :  { %p439_p12 = scmp.lt.s32.totalorder %s907_s12, %s433_s11 }
  0x22   :  { %p440_p13 = por %p439_p12, %p438_p11 }
  0x24   :  { %p441_p0 = pnand %p440_p13, %p434_p10 }
  0x26   :  { %444 = shalt.err (!%p441_p0)  }
  0x27   :  { %26 = dma.hbm_to_vmem [thread:$0]  %s15_s3, 16, %s881_s21, [#allocation2] }
  0x28   :  { %s30_s15 = scalar_lea.hbm %s1166_s1, %s362_s4  ;;  %s364_s16 = sshll.u32 %s883_s25, 4 }
  0x29   :  { %s445_s17 = scalar_lea.hbm %s30_s15, 16  ;;  %p448_p2 = scmp.lt.u32.totalorder %s30_s15, %s1166_s1 }
  0x2a   :  { %p446_p1 = scmp.ne.s32.totalorder %s30_s15, %s445_s17  ;;  %p449_p3 = scmp.lt.u32.totalorder %s898_s8, %s445_s17 }
  0x2b   :  { %p451_p5 = scmp.lt.u32.totalorder %s445_s17, %s30_s15 }
  0x2c   :  { %p450_p4 = por %p449_p3, %p448_p2 }
  0x2e   :  { %p452_p6 = por %p451_p5, %p450_p4 }
  0x30   :  { %p453_p7 = pnand %p452_p6, %p446_p1 }
  0x32   :  { %456 = shalt.err (!%p453_p7)  }
  0x33   :  { %s457_s20 = scalar_lea.vmem %s885_s24, 16  ;;  %p462_p9 = scmp.lt.s32.totalorder %s885_s24, %s881_s21 }
  0x34   :  { %p458_p8 = scmp.ne.s32.totalorder %s885_s24, %s457_s20  ;;  %p463_p10 = scmp.lt.s32.totalorder %s907_s12, %s457_s20 }
  0x36   :  { %p464_p12 = por %p463_p10, %p462_p9 }
  0x38   :  { %p465_p13 = pnand %p464_p12, %p458_p8 }
  0x3a   :  { %468 = shalt.err (!%p465_p13)  }
  0x3b   :  { %42 = dma.hbm_to_vmem [thread:$0]  %s30_s15, 16, %s885_s24, [#allocation2] }
  0x3c   :  { %s46_s25 = scalar_lea.hbm %s1166_s1, %s364_s16  ;;  %s366_s26 = sshll.u32 %s887_s27, 4 }
  0x3d   :  { %s469_s28 = scalar_lea.hbm %s46_s25, 16  ;;  %p472_p1 = scmp.lt.u32.totalorder %s46_s25, %s1166_s1 }
  0x3e   :  { %p470_p0 = scmp.ne.s32.totalorder %s46_s25, %s469_s28  ;;  %p473_p2 = scmp.lt.u32.totalorder %s898_s8, %s469_s28 }
  0x3f   :  { %p475_p4 = scmp.lt.u32.totalorder %s469_s28, %s46_s25 }
  0x40   :  { %p474_p3 = por %p473_p2, %p472_p1 }
  0x42   :  { %p476_p5 = por %p475_p4, %p474_p3 }
  0x44   :  { %p477_p6 = pnand %p476_p5, %p470_p0 }
  0x46   :  { %480 = shalt.err (!%p477_p6)  }
  0x47   :  { %s481_s24 = scalar_lea.vmem %s889_s0, 16  ;;  %p486_p8 = scmp.lt.s32.totalorder %s889_s0, %s881_s21 }
  0x48   :  { %p482_p7 = scmp.ne.s32.totalorder %s889_s0, %s481_s24  ;;  %p487_p9 = scmp.lt.s32.totalorder %s907_s12, %s481_s24 }
  0x4a   :  { %p488_p10 = por %p487_p9, %p486_p8 }
  0x4c   :  { %p489_p12 = pnand %p488_p10, %p482_p7 }
  0x4e   :  { %492 = shalt.err (!%p489_p12)  }
  0x4f   :  { %58 = dma.hbm_to_vmem [thread:$0]  %s46_s25, 16, %s889_s0, [#allocation2] }
  0x50   :  { %s62_s4 = scalar_lea.hbm %s1166_s1, %s366_s26  ;;  %s837_s5 = smov [#allocation5 + $0x3]  }
  0x51   :  { %s71_s6 = sshll.u32 %s837_s5, 4  ;;  %s947_s7 = sld [smem:[#allocation4 + $0x4]]  ;;  %s72_s6 = int_to_ptr.vmem [resolvable:$true] %s71_s6 }
  0x52   :  { %s493_s9 = scalar_lea.hbm %s62_s4, 16  ;;  %p496_p0 = scmp.lt.u32.totalorder %s62_s4, %s1166_s1 }
  0x53   :  { %p494_p13 = scmp.ne.s32.totalorder %s62_s4, %s493_s9  ;;  %p497_p1 = scmp.lt.u32.totalorder %s898_s8, %s493_s9 }
  0x54   :  { %p499_p3 = scmp.lt.u32.totalorder %s493_s9, %s62_s4 }
  0x55   :  { %p498_p2 = por %p497_p1, %p496_p0 }
  0x57   :  { %p500_p4 = por %p499_p3, %p498_p2 }
  0x59   :  { %p501_p5 = pnand %p500_p4, %p494_p13 }
  0x5b   :  { %504 = shalt.err (!%p501_p5)  }
  0x5c   :  { %s505_s0 = scalar_lea.vmem %s72_s6, 16  ;;  %p510_p7 = scmp.lt.s32.totalorder %s72_s6, %s881_s21 }
  0x5d   :  { %p506_p6 = scmp.ne.s32.totalorder %s72_s6, %s505_s0  ;;  %p511_p8 = scmp.lt.s32.totalorder %s907_s12, %s505_s0 }
  0x5f   :  { %p512_p9 = por %p511_p8, %p510_p7 }
  0x61   :  { %p513_p10 = pnand %p512_p9, %p506_p6 }
  0x63   :  { %516 = shalt.err (!%p513_p10)  }
  0x64   :  { %74 = dma.hbm_to_vmem [thread:$0]  %s62_s4, 16, %s72_s6, [#allocation2] }
  0x65   :  { %s838_s13 = smov [#allocation5 + $0x4]   ;;  %s955_s15 = sld [smem:[#allocation4 + $0x5]] }
  0x66   :  { %s87_s14 = sshll.u32 %s838_s13, 4  ;;  %s839_s16 = smov [#allocation5 + $0x5]   ;;  %s88_s14 = int_to_ptr.vmem [resolvable:$true] %s87_s14 }
  0x67   :  { %s103_s17 = sshll.u32 %s839_s16, 4  ;;  %s957_s18 = sld [smem:[#allocation4 + $0x6]]  ;;  %s960_s17 = int_to_ptr.vmem [resolvable:$true] %s103_s17 }
  0x68   :  { %s368_s19 = sshll.u32 %s947_s7, 4 }
  0x69   :  { %s78_s23 = scalar_lea.hbm %s1166_s1, %s368_s19 }
  0x6a   :  { %s517_s25 = scalar_lea.hbm %s78_s23, 16  ;;  %p520_p13 = scmp.lt.u32.totalorder %s78_s23, %s1166_s1 }
  0x6b   :  { %p518_p12 = scmp.ne.s32.totalorder %s78_s23, %s517_s25  ;;  %p521_p0 = scmp.lt.u32.totalorder %s898_s8, %s517_s25 }
  0x6c   :  { %p523_p2 = scmp.lt.u32.totalorder %s517_s25, %s78_s23 }
  0x6d   :  { %p522_p1 = por %p521_p0, %p520_p13 }
  0x6f   :  { %p524_p3 = por %p523_p2, %p522_p1 }
  0x71   :  { %p525_p4 = pnand %p524_p3, %p518_p12 }
  0x73   :  { %528 = shalt.err (!%p525_p4)  }
  0x74   :  { %s529_s29 = scalar_lea.vmem %s88_s14, 16  ;;  %p534_p6 = scmp.lt.s32.totalorder %s88_s14, %s881_s21 }
  0x75   :  { %p530_p5 = scmp.ne.s32.totalorder %s88_s14, %s529_s29  ;;  %p535_p7 = scmp.lt.s32.totalorder %s907_s12, %s529_s29 }
  0x77   :  { %p536_p8 = por %p535_p7, %p534_p6 }
  0x79   :  { %p537_p9 = pnand %p536_p8, %p530_p5 }
  0x7b   :  { %540 = shalt.err (!%p537_p9)  }
  0x7c   :  { %90 = dma.hbm_to_vmem [thread:$0]  %s78_s23, 16, %s88_s14, [#allocation2] }
  0x7d   :  { %s370_s30 = sshll.u32 %s955_s15, 4  ;;  %s840_s24 = smov [#allocation5 + $0x6]  }
  0x7e   :  { %s119_s27 = sshll.u32 %s840_s24, 4  ;;  %s94_s5 = scalar_lea.hbm %s1166_s1, %s370_s30  ;;  %s975_s27 = int_to_ptr.vmem [resolvable:$true] %s119_s27 }
  0x7f   :  { %s541_s6 = scalar_lea.hbm %s94_s5, 16  ;;  %p544_p12 = scmp.lt.u32.totalorder %s94_s5, %s1166_s1 }
  0x80   :  { %p542_p10 = scmp.ne.s32.totalorder %s94_s5, %s541_s6  ;;  %p545_p13 = scmp.lt.u32.totalorder %s898_s8, %s541_s6 }
  0x81   :  { %p547_p1 = scmp.lt.u32.totalorder %s541_s6, %s94_s5 }
  0x82   :  { %p546_p0 = por %p545_p13, %p544_p12 }
  0x84   :  { %p548_p2 = por %p547_p1, %p546_p0 }
  0x86   :  { %p549_p3 = pnand %p548_p2, %p542_p10 }
  0x88   :  { %552 = shalt.err (!%p549_p3)  }
  0x89   :  { %s553_s10 = scalar_lea.vmem %s960_s17, 16  ;;  %p558_p5 = scmp.lt.s32.totalorder %s960_s17, %s881_s21 }
  0x8a   :  { %p554_p4 = scmp.ne.s32.totalorder %s960_s17, %s553_s10  ;;  %p559_p6 = scmp.lt.s32.totalorder %s907_s12, %s553_s10 }
  0x8c   :  { %p560_p7 = por %p559_p6, %p558_p5 }
  0x8e   :  { %p561_p8 = pnand %p560_p7, %p554_p4 }
  0x90   :  { %564 = shalt.err (!%p561_p8)  }
  0x91   :  { %106 = dma.hbm_to_vmem [thread:$0]  %s94_s5, 16, %s960_s17, [#allocation2] }
  0x92   :  { %s372_s11 = sshll.u32 %s957_s18, 4  ;;  %s988_s0 = sld [smem:[#allocation4 + $0x7]] }
  0x93   :  { %s110_s15 = scalar_lea.hbm %s1166_s1, %s372_s11 }
  0x94   :  { %s565_s16 = scalar_lea.hbm %s110_s15, 16  ;;  %p568_p10 = scmp.lt.u32.totalorder %s110_s15, %s1166_s1 }
  0x95   :  { %p566_p9 = scmp.ne.s32.totalorder %s110_s15, %s565_s16  ;;  %p569_p12 = scmp.lt.u32.totalorder %s898_s8, %s565_s16 }
  0x96   :  { %p571_p0 = scmp.lt.u32.totalorder %s565_s16, %s110_s15 }
  0x97   :  { %p570_p13 = por %p569_p12, %p568_p10 }
  0x99   :  { %p572_p1 = por %p571_p0, %p570_p13 }
  0x9b   :  { %p573_p2 = pnand %p572_p1, %p566_p9 }
  0x9d   :  { %576 = shalt.err (!%p573_p2)  }
  0x9e   :  { %s577_s17 = scalar_lea.vmem %s975_s27, 16  ;;  %p582_p4 = scmp.lt.s32.totalorder %s975_s27, %s881_s21 }
  0x9f   :  { %p578_p3 = scmp.ne.s32.totalorder %s975_s27, %s577_s17  ;;  %p583_p5 = scmp.lt.s32.totalorder %s907_s12, %s577_s17 }
  0xa1   :  { %p584_p6 = por %p583_p5, %p582_p4 }
  0xa3   :  { %p585_p7 = pnand %p584_p6, %p578_p3 }
  0xa5   :  { %588 = shalt.err (!%p585_p7)  }
  0xa6   :  { %122 = dma.hbm_to_vmem [thread:$0]  %s110_s15, 16, %s975_s27, [#allocation2] }
  0xa7   :  { %s841_s18 = smov [#allocation5 + $0x7]   ;;  %s1003_s23 = sld [smem:[#allocation4 + $0x8]] }
  0xa8   :  { %s135_s22 = sshll.u32 %s841_s18, 4  ;;  %s842_s25 = smov [#allocation5 + $0x8]   ;;  %s136_s22 = int_to_ptr.vmem [resolvable:$true] %s135_s22 }
  0xa9   :  { %s151_s26 = sshll.u32 %s842_s25, 4  ;;  %s1005_s28 = sld [smem:[#allocation4 + $0x9]]  ;;  %s1008_s26 = int_to_ptr.vmem [resolvable:$true] %s151_s26 }
  0xaa   :  { %s374_s29 = sshll.u32 %s988_s0, 4 }
  0xab   :  { %s126_s3 = scalar_lea.hbm %s1166_s1, %s374_s29 }
  0xac   :  { %s589_s4 = scalar_lea.hbm %s126_s3, 16  ;;  %p592_p9 = scmp.lt.u32.totalorder %s126_s3, %s1166_s1 }
  0xad   :  { %p590_p8 = scmp.ne.s32.totalorder %s126_s3, %s589_s4  ;;  %p593_p10 = scmp.lt.u32.totalorder %s898_s8, %s589_s4 }
  0xae   :  { %p595_p13 = scmp.lt.u32.totalorder %s589_s4, %s126_s3 }
  0xaf   :  { %p594_p12 = por %p593_p10, %p592_p9 }
  0xb1   :  { %p596_p0 = por %p595_p13, %p594_p12 }
  0xb3   :  { %p597_p1 = pnand %p596_p0, %p590_p8 }
  0xb5   :  { %600 = shalt.err (!%p597_p1)  }
  0xb6   :  { %s601_s6 = scalar_lea.vmem %s136_s22, 16  ;;  %p606_p3 = scmp.lt.s32.totalorder %s136_s22, %s881_s21 }
  0xb7   :  { %p602_p2 = scmp.ne.s32.totalorder %s136_s22, %s601_s6  ;;  %p607_p4 = scmp.lt.s32.totalorder %s907_s12, %s601_s6 }
  0xb9   :  { %p608_p5 = por %p607_p4, %p606_p3 }
  0xbb   :  { %p609_p6 = pnand %p608_p5, %p602_p2 }
  0xbd   :  { %612 = shalt.err (!%p609_p6)  }
  0xbe   :  { %138 = dma.hbm_to_vmem [thread:$0]  %s126_s3, 16, %s136_s22, [#allocation2] }
  0xbf   :  { %s376_s7 = sshll.u32 %s1003_s23, 4  ;;  %s843_s9 = smov [#allocation5 + $0x9]  }
  0xc0   :  { %s167_s10 = sshll.u32 %s843_s9, 4  ;;  %s142_s13 = scalar_lea.hbm %s1166_s1, %s376_s7  ;;  %s1023_s10 = int_to_ptr.vmem [resolvable:$true] %s167_s10 }
  0xc1   :  { %s613_s14 = scalar_lea.hbm %s142_s13, 16  ;;  %p616_p8 = scmp.lt.u32.totalorder %s142_s13, %s1166_s1 }
  0xc2   :  { %p614_p7 = scmp.ne.s32.totalorder %s142_s13, %s613_s14  ;;  %p617_p9 = scmp.lt.u32.totalorder %s898_s8, %s613_s14 }
  0xc3   :  { %p619_p12 = scmp.lt.u32.totalorder %s613_s14, %s142_s13 }
  0xc4   :  { %p618_p10 = por %p617_p9, %p616_p8 }
  0xc6   :  { %p620_p13 = por %p619_p12, %p618_p10 }
  0xc8   :  { %p621_p0 = pnand %p620_p13, %p614_p7 }
  0xca   :  { %624 = shalt.err (!%p621_p0)  }
  0xcb   :  { %s625_s19 = scalar_lea.vmem %s1008_s26, 16  ;;  %p630_p2 = scmp.lt.s32.totalorder %s1008_s26, %s881_s21 }
  0xcc   :  { %p626_p1 = scmp.ne.s32.totalorder %s1008_s26, %s625_s19  ;;  %p631_p3 = scmp.lt.s32.totalorder %s907_s12, %s625_s19 }
  0xce   :  { %p632_p4 = por %p631_p3, %p630_p2 }
  0xd0   :  { %p633_p5 = pnand %p632_p4, %p626_p1 }
  0xd2   :  { %636 = shalt.err (!%p633_p5)  }
  0xd3   :  { %154 = dma.hbm_to_vmem [thread:$0]  %s142_s13, 16, %s1008_s26, [#allocation2] }
  0xd4   :  { %s378_s20 = sshll.u32 %s1005_s28, 4  ;;  %s1036_s17 = sld [smem:[#allocation4 + $0xa]] }
  0xd5   :  { %s158_s23 = scalar_lea.hbm %s1166_s1, %s378_s20 }
  0xd6   :  { %s637_s25 = scalar_lea.hbm %s158_s23, 16  ;;  %p640_p7 = scmp.lt.u32.totalorder %s158_s23, %s1166_s1 }
  0xd7   :  { %p638_p6 = scmp.ne.s32.totalorder %s158_s23, %s637_s25  ;;  %p641_p8 = scmp.lt.u32.totalorder %s898_s8, %s637_s25 }
  0xd8   :  { %p643_p10 = scmp.lt.u32.totalorder %s637_s25, %s158_s23 }
  0xd9   :  { %p642_p9 = por %p641_p8, %p640_p7 }
  0xdb   :  { %p644_p12 = por %p643_p10, %p642_p9 }
  0xdd   :  { %p645_p13 = pnand %p644_p12, %p638_p6 }
  0xdf   :  { %648 = shalt.err (!%p645_p13)  }
  0xe0   :  { %s649_s26 = scalar_lea.vmem %s1023_s10, 16  ;;  %p654_p1 = scmp.lt.s32.totalorder %s1023_s10, %s881_s21 }
  0xe1   :  { %p650_p0 = scmp.ne.s32.totalorder %s1023_s10, %s649_s26  ;;  %p655_p2 = scmp.lt.s32.totalorder %s907_s12, %s649_s26 }
  0xe3   :  { %p656_p3 = por %p655_p2, %p654_p1 }
  0xe5   :  { %p657_p4 = pnand %p656_p3, %p650_p0 }
  0xe7   :  { %660 = shalt.err (!%p657_p4)  }
  0xe8   :  { %170 = dma.hbm_to_vmem [thread:$0]  %s158_s23, 16, %s1023_s10, [#allocation2] }
  0xe9   :  { %s844_s28 = smov [#allocation5 + $0xa]   ;;  %s1051_s3 = sld [smem:[#allocation4 + $0xb]] }
  0xea   :  { %s183_s24 = sshll.u32 %s844_s28, 4  ;;  %s845_s4 = smov [#allocation5 + $0xb]   ;;  %s184_s24 = int_to_ptr.vmem [resolvable:$true] %s183_s24 }
  0xeb   :  { %s199_s5 = sshll.u32 %s845_s4, 4  ;;  %s1053_s27 = sld [smem:[#allocation4 + $0xc]]  ;;  %s1056_s5 = int_to_ptr.vmem [resolvable:$true] %s199_s5 }
  0xec   :  { %s380_s6 = sshll.u32 %s1036_s17, 4 }
  0xed   :  { %s174_s11 = scalar_lea.hbm %s1166_s1, %s380_s6 }
  0xee   :  { %s661_s0 = scalar_lea.hbm %s174_s11, 16  ;;  %p664_p6 = scmp.lt.u32.totalorder %s174_s11, %s1166_s1 }
  0xef   :  { %p662_p5 = scmp.ne.s32.totalorder %s174_s11, %s661_s0  ;;  %p665_p7 = scmp.lt.u32.totalorder %s898_s8, %s661_s0 }
  0xf0   :  { %p667_p9 = scmp.lt.u32.totalorder %s661_s0, %s174_s11 }
  0xf1   :  { %p666_p8 = por %p665_p7, %p664_p6 }
  0xf3   :  { %p668_p10 = por %p667_p9, %p666_p8 }
  0xf5   :  { %p669_p12 = pnand %p668_p10, %p662_p5 }
  0xf7   :  { %672 = shalt.err (!%p669_p12)  }
  0xf8   :  { %s673_s14 = scalar_lea.vmem %s184_s24, 16  ;;  %p678_p0 = scmp.lt.s32.totalorder %s184_s24, %s881_s21 }
  0xf9   :  { %p674_p13 = scmp.ne.s32.totalorder %s184_s24, %s673_s14  ;;  %p679_p1 = scmp.lt.s32.totalorder %s907_s12, %s673_s14 }
  0xfb   :  { %p680_p2 = por %p679_p1, %p678_p0 }
  0xfd   :  { %p681_p3 = pnand %p680_p2, %p674_p13 }
  0xff   :  { %684 = shalt.err (!%p681_p3)  }
 0x100   :  { %186 = dma.hbm_to_vmem [thread:$0]  %s174_s11, 16, %s184_s24, [#allocation2] }
 0x101   :  { %s382_s15 = sshll.u32 %s1051_s3, 4  ;;  %s846_s16 = smov [#allocation5 + $0xc]  }
 0x102   :  { %s215_s19 = sshll.u32 %s846_s16, 4  ;;  %s190_s18 = scalar_lea.hbm %s1166_s1, %s382_s15  ;;  %s1071_s19 = int_to_ptr.vmem [resolvable:$true] %s215_s19 }
 0x103   :  { %s685_s22 = scalar_lea.hbm %s190_s18, 16  ;;  %p688_p5 = scmp.lt.u32.totalorder %s190_s18, %s1166_s1 }
 0x104   :  { %p686_p4 = scmp.ne.s32.totalorder %s190_s18, %s685_s22  ;;  %p689_p6 = scmp.lt.u32.totalorder %s898_s8, %s685_s22 }
 0x105   :  { %p691_p8 = scmp.lt.u32.totalorder %s685_s22, %s190_s18 }
 0x106   :  { %p690_p7 = por %p689_p6, %p688_p5 }
 0x108   :  { %p692_p9 = por %p691_p8, %p690_p7 }
 0x10a   :  { %p693_p10 = pnand %p692_p9, %p686_p4 }
 0x10c   :  { %696 = shalt.err (!%p693_p10)  }
 0x10d   :  { %s697_s29 = scalar_lea.vmem %s1056_s5, 16  ;;  %p702_p13 = scmp.lt.s32.totalorder %s1056_s5, %s881_s21 }
 0x10e   :  { %p698_p12 = scmp.ne.s32.totalorder %s1056_s5, %s697_s29  ;;  %p703_p0 = scmp.lt.s32.totalorder %s907_s12, %s697_s29 }
 0x110   :  { %p704_p1 = por %p703_p0, %p702_p13 }
 0x112   :  { %p705_p2 = pnand %p704_p1, %p698_p12 }
 0x114   :  { %708 = shalt.err (!%p705_p2)  }
 0x115   :  { %202 = dma.hbm_to_vmem [thread:$0]  %s190_s18, 16, %s1056_s5, [#allocation2] }
 0x116   :  { %s384_s30 = sshll.u32 %s1053_s27, 4  ;;  %s1084_s26 = sld [smem:[#allocation4 + $0xd]] }
 0x117   :  { %s206_s3 = scalar_lea.hbm %s1166_s1, %s384_s30 }
 0x118   :  { %s709_s4 = scalar_lea.hbm %s206_s3, 16  ;;  %p712_p4 = scmp.lt.u32.totalorder %s206_s3, %s1166_s1 }
 0x119   :  { %p710_p3 = scmp.ne.s32.totalorder %s206_s3, %s709_s4  ;;  %p713_p5 = scmp.lt.u32.totalorder %s898_s8, %s709_s4 }
 0x11a   :  { %p715_p7 = scmp.lt.u32.totalorder %s709_s4, %s206_s3 }
 0x11b   :  { %p714_p6 = por %p713_p5, %p712_p4 }
 0x11d   :  { %p716_p8 = por %p715_p7, %p714_p6 }
 0x11f   :  { %p717_p9 = pnand %p716_p8, %p710_p3 }
 0x121   :  { %720 = shalt.err (!%p717_p9)  }
 0x122   :  { %s721_s5 = scalar_lea.vmem %s1071_s19, 16  ;;  %p726_p12 = scmp.lt.s32.totalorder %s1071_s19, %s881_s21 }
 0x123   :  { %p722_p10 = scmp.ne.s32.totalorder %s1071_s19, %s721_s5  ;;  %p727_p13 = scmp.lt.s32.totalorder %s907_s12, %s721_s5 }
 0x125   :  { %p728_p0 = por %p727_p13, %p726_p12 }
 0x127   :  { %p729_p1 = pnand %p728_p0, %p722_p10 }
 0x129   :  { %732 = shalt.err (!%p729_p1)  }
 0x12a   :  { %218 = dma.hbm_to_vmem [thread:$0]  %s206_s3, 16, %s1071_s19, [#allocation2] }
 0x12b   :  { %s847_s27 = smov [#allocation5 + $0xd]   ;;  %s1099_s11 = sld [smem:[#allocation4 + $0xe]] }
 0x12c   :  { %s231_s9 = sshll.u32 %s847_s27, 4  ;;  %s848_s0 = smov [#allocation5 + $0xe]   ;;  %s232_s9 = int_to_ptr.vmem [resolvable:$true] %s231_s9 }
 0x12d   :  { %s247_s13 = sshll.u32 %s848_s0, 4  ;;  %s1101_s10 = sld [smem:[#allocation4 + $0xf]]  ;;  %s1104_s13 = int_to_ptr.vmem [resolvable:$true] %s247_s13 }
 0x12e   :  { %s386_s14 = sshll.u32 %s1084_s26, 4 }
 0x12f   :  { %s222_s20 = scalar_lea.hbm %s1166_s1, %s386_s14 }
 0x130   :  { %s733_s17 = scalar_lea.hbm %s222_s20, 16  ;;  %p736_p3 = scmp.lt.u32.totalorder %s222_s20, %s1166_s1 }
 0x131   :  { %p734_p2 = scmp.ne.s32.totalorder %s222_s20, %s733_s17  ;;  %p737_p4 = scmp.lt.u32.totalorder %s898_s8, %s733_s17 }
 0x132   :  { %p739_p6 = scmp.lt.u32.totalorder %s733_s17, %s222_s20 }
 0x133   :  { %p738_p5 = por %p737_p4, %p736_p3 }
 0x135   :  { %p740_p7 = por %p739_p6, %p738_p5 }
 0x137   :  { %p741_p8 = pnand %p740_p7, %p734_p2 }
 0x139   :  { %744 = shalt.err (!%p741_p8)  }
 0x13a   :  { %s745_s22 = scalar_lea.vmem %s232_s9, 16  ;;  %p750_p10 = scmp.lt.s32.totalorder %s232_s9, %s881_s21 }
 0x13b   :  { %p746_p9 = scmp.ne.s32.totalorder %s232_s9, %s745_s22  ;;  %p751_p12 = scmp.lt.s32.totalorder %s907_s12, %s745_s22 }
 0x13d   :  { %p752_p13 = por %p751_p12, %p750_p10 }
 0x13f   :  { %p753_p0 = pnand %p752_p13, %p746_p9 }
 0x141   :  { %756 = shalt.err (!%p753_p0)  }
 0x142   :  { %234 = dma.hbm_to_vmem [thread:$0]  %s222_s20, 16, %s232_s9, [#allocation2] }
 0x143   :  { %s388_s23 = sshll.u32 %s1099_s11, 4  ;;  %s849_s25 = smov [#allocation5 + $0xf]  }
 0x144   :  { %s263_s29 = sshll.u32 %s849_s25, 4  ;;  %s238_s28 = scalar_lea.hbm %s1166_s1, %s388_s23  ;;  %s1119_s29 = int_to_ptr.vmem [resolvable:$true] %s263_s29 }
 0x145   :  { %s757_s24 = scalar_lea.hbm %s238_s28, 16  ;;  %p760_p2 = scmp.lt.u32.totalorder %s238_s28, %s1166_s1 }
 0x146   :  { %p758_p1 = scmp.ne.s32.totalorder %s238_s28, %s757_s24  ;;  %p761_p3 = scmp.lt.u32.totalorder %s898_s8, %s757_s24 }
 0x147   :  { %p763_p5 = scmp.lt.u32.totalorder %s757_s24, %s238_s28 }
 0x148   :  { %p762_p4 = por %p761_p3, %p760_p2 }
 0x14a   :  { %p764_p6 = por %p763_p5, %p762_p4 }
 0x14c   :  { %p765_p7 = pnand %p764_p6, %p758_p1 }
 0x14e   :  { %768 = shalt.err (!%p765_p7)  }
 0x14f   :  { %s769_s6 = scalar_lea.vmem %s1104_s13, 16  ;;  %p774_p9 = scmp.lt.s32.totalorder %s1104_s13, %s881_s21 }
 0x150   :  { %p770_p8 = scmp.ne.s32.totalorder %s1104_s13, %s769_s6  ;;  %p775_p10 = scmp.lt.s32.totalorder %s907_s12, %s769_s6 }
 0x152   :  { %p776_p12 = por %p775_p10, %p774_p9 }
 0x154   :  { %p777_p13 = pnand %p776_p12, %p770_p8 }
 0x156   :  { %780 = shalt.err (!%p777_p13)  }
 0x157   :  { %250 = dma.hbm_to_vmem [thread:$0]  %s238_s28, 16, %s1104_s13, [#allocation2] }
 0x158   :  { %s390_s7 = sshll.u32 %s1101_s10, 4 }
 0x159   :  { %s254_s9 = scalar_lea.hbm %s1166_s1, %s390_s7 }
 0x15a   :  { %s781_s11 = scalar_lea.hbm %s254_s9, 16  ;;  %p784_p1 = scmp.lt.u32.totalorder %s254_s9, %s1166_s1 }
 0x15b   :  { %p782_p0 = scmp.ne.s32.totalorder %s254_s9, %s781_s11  ;;  %p785_p2 = scmp.lt.u32.totalorder %s898_s8, %s781_s11 }
 0x15c   :  { %p787_p4 = scmp.lt.u32.totalorder %s781_s11, %s254_s9 }
 0x15d   :  { %p786_p3 = por %p785_p2, %p784_p1 }
 0x15f   :  { %p788_p5 = por %p787_p4, %p786_p3 }
 0x161   :  { %p789_p6 = pnand %p788_p5, %p782_p0 }
 0x163   :  { %792 = shalt.err (!%p789_p6)  }
 0x164   :  { %s793_s13 = scalar_lea.vmem %s1119_s29, 16  ;;  %p798_p8 = scmp.lt.s32.totalorder %s1119_s29, %s881_s21 }
 0x165   :  { %p794_p7 = scmp.ne.s32.totalorder %s1119_s29, %s793_s13  ;;  %p799_p9 = scmp.lt.s32.totalorder %s907_s12, %s793_s13 }
 0x167   :  { %p800_p10 = por %p799_p9, %p798_p8 }
 0x169   :  { %p801_p12 = pnand %p800_p10, %p794_p7 }
 0x16b   :  { %804 = shalt.err (!%p801_p12)  }
 0x16c   :  { %266 = dma.hbm_to_vmem [thread:$0]  %s254_s9, 16, %s1119_s29, [#allocation2] }
 0x16d   :  { %829 = dma.done.wait [#allocation2], 256 }
 0x16e   :  { %830 = vsyncadd [#allocation2], 4294967040  ;;  %v300_v0 = vld [vmem:[#allocation5] sm:$0xff]  ;;  %v301_v1 = vld [vmem:[#allocation5 + $0x8] sm:$0xff]  ;;  %p806_p13 = scmp.ne.s32.totalorder %s881_s21, %s907_s12  ;;  %p811_p0 = scmp.lt.s32.totalorder %s907_s12, %s907_s12 }
 0x16f   :  { %v302_v2 = vmul.f32 11.313708, %v300_v0  ;;  %v303_v3 = vmul.f32 11.313708, %v301_v1 }
 0x170   :  { %p812_p1 = por %p811_p0, %p438_p11 }
 0x171   :  { %304 = vst [vmem:[#allocation5] sm:$0xff] %v302_v2  ;;  %305 = vst [vmem:[#allocation5 + $0x8] sm:$0xff] %v303_v3 }
 0x172   :  { %p813_p2 = pnand %p812_p1, %p806_p13 }
 0x174   :  { %816 = shalt.err (!%p813_p2)
}
 0x175   :  { %s817_s10 = scalar_lea.hbm %s1167_s2, 256 }
 0x176   :  { %p818_p3 = scmp.ne.s32.totalorder %s1167_s2, %s817_s10  ;;  %p821_p4 = scmp.lt.u32.totalorder %s817_s10, %s1167_s2 }
 0x178   :  { %p823_p5 = pnand %p821_p4, %p818_p3 }
 0x17a   :  { %826 = shalt.err (!%p823_p5)
}
 0x17b   :  { %s850_s18 = smov 128   ;;  %s851_s12 = smov 8  }
 0x17c   :  { %317 = dma.vmem_to_hbm [thread:$0]  %s881_s21, 256, %s1167_s2, [#allocation6], %s850_s18, %s850_s18, %s851_s12  }
 0x17d   :  { %831 = dma.done.wait [#allocation6], 256  }
 0x17e   :  { %832 = vsyncadd [#allocation6], 4294967040 }
 0x17f   :  { %321 = vsyncpa [#allocation6], 1 }
 0x180   :  { %322 = vsyncmov [#allocation2] }
 0x183   :  { %s323_s23 = vpop.sfrf %322 }
 0x184   :  { %p391_p11 = scmp.ne.s32.totalorder %s323_s23, 0 }
 0x186   :  { %327 = shalt.err (%p391_p11)  }

</bundles_post_ra>
